<compile_context>
chip_gen: v5e
topology: v5e:2x2
jax: 0.10.0
libtpu: 0.0.40
codegen_flags: <defaults>
</compile_context>

<pallas_src>
from functools import partial

import jax
import jax.numpy as jnp
from jax.experimental import pallas as pl
from jax.experimental.pallas import tpu as pltpu


_V7X_TILE_CAP = 8192  # packed rows; keeps double-buffered VMEM under v7x budget


def _round_up(x, m):
    return ((x + m - 1) // m) * m


def _fair_decoder_kernel(z_ref, s_ref, wz_ref, ws_ref, b_ref, o_ref):
    # z_ref : (tile, g*L)   packed latent rows (streamed)
    # s_ref : (tile, g)     packed sensitive attribute (streamed, 1 f32/row)
    # wz_ref: (g*L, g*O)    kron(I_g, W[:, :L]^T), resident in VMEM
    # ws_ref: (g,   g*O)    kron(I_g, W[:, L]^T),  resident in VMEM
    # b_ref : (1,   g*O)    bias tiled g times,    resident in VMEM
    # o_ref : (tile, g*O)   packed outputs (lane-dense, unmasked 128-lane vst)
    acc = jnp.dot(z_ref[...], wz_ref[...], preferred_element_type=jnp.float32)
    acc = acc + jnp.dot(s_ref[...], ws_ref[...], preferred_element_type=jnp.float32)
    o_ref[...] = (acc + b_ref[...]).astype(o_ref.dtype)


def make_fair_decoder_params(W, b, *, lane_width=128):
    """One-time parameter prep (NOT in the per-call path).

    W: (O, L+1) PyTorch-layout Linear weight, b: (O,).
    Returns (Wz_p, Ws_p, bp, g):
      g    = logical rows packed per 128-lane row (1 if O doesn't divide 128)
      Wz_p = kron(I_g, W[:, :L]^T)             (g*L, g*O)  -- z contribution
      Ws_p = kron(I_g, W[:, L].reshape(1, O))  (g,   g*O)  -- s contribution
      bp   = tile(b, g)                        (1,   g*O)
    """
    O, K = W.shape
    L = K - 1
    Wz_t = W[:, :L].T.astype(W.dtype)            # (L, O), transposed once
    ws = W[:, L].reshape(1, O).astype(W.dtype)   # (1, O)
    if O < lane_width and lane_width % O == 0:
        g = lane_width // O
        eye = jnp.eye(g, dtype=W.dtype)
        Wz_p = jnp.kron(eye, Wz_t)               # (g*L, g*O) block-diagonal
        Ws_p = jnp.kron(eye, ws)                 # (g,   g*O) block-diagonal
        bp = jnp.tile(b.reshape(1, O), (1, g))   # (1,   g*O)
    else:
        g = 1
        Wz_p, Ws_p, bp = Wz_t, ws, b.reshape(1, O)
    return Wz_p, Ws_p, bp, g


@partial(jax.jit, static_argnames=("g", "tile_m", "min_kernel_rows"))
def fair_decoder_forward(z, s, Wz_p, Ws_p, bp, *, g, tile_m=2048,
                         min_kernel_rows=4096):
    """z: (B, L), s: (B,) -> (B, O) == cat([z, s.view(-1,1)], 1) @ W^T + b."""
    B, L = z.shape
    gL, gO = Wz_p.shape
    assert gL == g * L, "weight/latent_dim mismatch"
    O = gO // g

    s = s.reshape(-1).astype(z.dtype)

    # Packing needs B % g == 0; pad at most g-1 rows, and only when required
    # (common case B % g == 0 does no copy).  Padded logical rows only ever
    # land in output rows that are sliced off at the end.
    pad = (-B) % g
    if pad:
        z = jnp.pad(z, ((0, pad), (0, 0)))
        s = jnp.pad(s, (0, pad))
    Bp = B + pad
    M = Bp // g

    zp = z.reshape(M, g * L)     # free row-major reshape: g logical rows/row
    sp = s.reshape(M, g)

    # Small-batch fast path: pallas_call launch overhead dominates below a few
    # thousand rows; plain XLA handles it better.
    if Bp < min_kernel_rows:
        out_p = zp @ Wz_p + sp @ Ws_p + bp
        return out_p.reshape(Bp, O)[:B]

    # Tile selection: large tiles amortize the ~0.35 us per-grid-step cost;
    # >= 2 grid steps so v7x's two TensorCores both get work; cap keeps the
    # double-buffered footprint inside v7x's smaller VMEM.
    if M <= 16:
        tile = M
    else:
        tile = max(8, min(tile_m, _V7X_TILE_CAP,
                          _round_up(pl.cdiv(M, 2), 8)))
    grid = (pl.cdiv(M, tile),)   # ragged last block is masked by Pallas

    itemsize = jnp.dtype(z.dtype).itemsize
    cost = pl.CostEstimate(
        flops=2 * M * (gL + g) * gO,
        transcendentals=0,
        bytes_accessed=(zp.size + sp.size + Wz_p.size + Ws_p.size + bp.size
                        + M * gO) * itemsize,
    )

    out_p = pl.pallas_call(
        _fair_decoder_kernel,
        out_shape=jax.ShapeDtypeStruct((M, gO), z.dtype),
        grid=grid,
        in_specs=[
            pl.BlockSpec((tile, gL), lambda i: (i, 0)),   # streamed z tiles
            pl.BlockSpec((tile, g), lambda i: (i, 0)),    # streamed s tiles
            pl.BlockSpec((gL, gO), lambda i: (0, 0)),     # resident z-weight
            pl.BlockSpec((g, gO), lambda i: (0, 0)),      # resident s-weight
            pl.BlockSpec((1, gO), lambda i: (0, 0)),      # resident bias
        ],
        out_specs=pl.BlockSpec((tile, gO), lambda i: (i, 0)),
        compiler_params=pltpu.CompilerParams(
            # Batch tiles are independent -> megacore-shardable on v7x.
            dimension_semantics=("parallel",),
        ),
        cost_estimate=cost,
    )(zp, sp, Wz_p, Ws_p, bp)

    # Unpack (M, g*O) -> (Bp, O): free row-major reshape; drop g-padding rows.
    return out_p.reshape(Bp, O)[:B]


def fair_decoder_reference(z, s, W, b):
    return jnp.concatenate([z, s.reshape(-1, 1)], axis=1) @ W.T + b


if __name__ == "__main__":
    key = jax.random.PRNGKey(0)
    k_z, k_s, k_w, k_b, k_z2, k_s2 = jax.random.split(key, 6)

    latent_dim = 31        # latent_dim + 1 = 32 features into the linear
    output_dim = 16

    # Deterministic parameter init (PyTorch Linear-style uniform bound).
    fan_in = latent_dim + 1
    bound = 1.0 / (fan_in ** 0.5)
    W = jax.random.uniform(k_w, (output_dim, fan_in), jnp.float32, -bound, bound)
    b = jax.random.uniform(k_b, (output_dim,), jnp.float32, -bound, bound)

    # One-time weight prep (transpose + kron lane-packing) outside the call path.
    Wz_p, Ws_p, bp, g = make_fair_decoder_params(W, b)

    # --- Small demo batch: force the Pallas path (production keeps the
    # small-batch XLA fast path enabled via the default min_kernel_rows). ---
    batch = 8
    z = jax.random.normal(k_z, (batch, latent_dim), dtype=jnp.float32)
    s = jax.random.bernoulli(k_s, 0.5, (batch,)).astype(jnp.float32)

    out = fair_decoder_forward(z, s, Wz_p, Ws_p, bp, g=g, min_kernel_rows=0)
    out = jax.block_until_ready(out)
    ref = fair_decoder_reference(z, s, W, b)
    assert out.shape == (batch, output_dim)
    assert jnp.allclose(out, ref, atol=1e-4, rtol=1e-4), "small-batch mismatch"

    # --- Ragged mid-size batch: exercises the g-padding path, a multi-step
    # "parallel" grid, and Pallas' masked ragged last block. ---
    batch2 = 4100
    z2 = jax.random.normal(k_z2, (batch2, latent_dim), dtype=jnp.float32)
    s2 = jax.random.bernoulli(k_s2, 0.5, (batch2,)).astype(jnp.float32)

    out2 = fair_decoder_forward(z2, s2, Wz_p, Ws_p, bp, g=g)
    out2 = jax.block_until_ready(out2)
    ref2 = fair_decoder_reference(z2, s2, W, b)
    assert out2.shape == (batch2, output_dim)
    assert jnp.allclose(out2, ref2, atol=1e-4, rtol=1e-4), "ragged-batch mismatch"

    print("KERNEL_OK")
</pallas_src>

<mosaic_0001>
module attributes {stable_mosaic.version = 11 : i64} {
  func.func @_fair_decoder_kernel(%arg0: i32, %arg1: memref<1x248xf32, #tpu.memory_space<vmem>>, %arg2: memref<1x8xf32, #tpu.memory_space<vmem>>, %arg3: memref<248x128xf32, #tpu.memory_space<vmem>>, %arg4: memref<8x128xf32, #tpu.memory_space<vmem>>, %arg5: memref<1x128xf32, #tpu.memory_space<vmem>>, %arg6: memref<1x128xf32, #tpu.memory_space<vmem>>) attributes {dimension_semantics = [#tpu.dimension_semantics<parallel>], iteration_bounds = array<i64: 1>, scalar_prefetch = 0 : i64, scratch_operands = 0 : i64, tpu.core_type = #tpu.core_type<tc>, window_params = [{transform_indices = @transform_0, window_bounds = array<i64: 1, 248>}, {transform_indices = @transform_1, window_bounds = array<i64: 1, 8>}, {pipeline_mode = #tpu.pipeline_mode<synchronous>, transform_indices = @transform_2, window_bounds = array<i64: 248, 128>}, {pipeline_mode = #tpu.pipeline_mode<synchronous>, transform_indices = @transform_3, window_bounds = array<i64: 8, 128>}, {pipeline_mode = #tpu.pipeline_mode<synchronous>, transform_indices = @transform_4, window_bounds = array<i64: 1, 128>}, {transform_indices = @transform_5, window_bounds = array<i64: 1, 128>}]} {
    %c0 = arith.constant 0 : index
    %c0_0 = arith.constant 0 : index
    %0 = vector.load %arg1[%c0, %c0_0] : memref<1x248xf32, #tpu.memory_space<vmem>>, vector<1x248xf32>
    %c0_1 = arith.constant 0 : index
    %c0_2 = arith.constant 0 : index
    %1 = vector.load %arg3[%c0_1, %c0_2] : memref<248x128xf32, #tpu.memory_space<vmem>>, vector<248x128xf32>
    %cst = arith.constant dense<0.000000e+00> : vector<1x128xf32>
    %2 = tpu.matmul %0, %1, %cst {dimension_numbers = #tpu.dot_dimension_numbers<[1], [0], [0], [1], [0, 0, 1, 1], [], []>} : vector<1x248xf32>, vector<248x128xf32>, vector<1x128xf32> -> vector<1x128xf32>
    %c0_3 = arith.constant 0 : index
    %c0_4 = arith.constant 0 : index
    %3 = vector.load %arg2[%c0_3, %c0_4] : memref<1x8xf32, #tpu.memory_space<vmem>>, vector<1x8xf32>
    %c0_5 = arith.constant 0 : index
    %c0_6 = arith.constant 0 : index
    %4 = vector.load %arg4[%c0_5, %c0_6] : memref<8x128xf32, #tpu.memory_space<vmem>>, vector<8x128xf32>
    %cst_7 = arith.constant dense<0.000000e+00> : vector<1x128xf32>
    %5 = tpu.matmul %3, %4, %cst_7 {dimension_numbers = #tpu.dot_dimension_numbers<[1], [0], [0], [1], [0, 0, 1, 1], [], []>} : vector<1x8xf32>, vector<8x128xf32>, vector<1x128xf32> -> vector<1x128xf32>
    %6 = arith.addf %2, %5 : vector<1x128xf32>
    %c0_8 = arith.constant 0 : index
    %c0_9 = arith.constant 0 : index
    %7 = vector.load %arg5[%c0_8, %c0_9] : memref<1x128xf32, #tpu.memory_space<vmem>>, vector<1x128xf32>
    %8 = arith.addf %6, %7 : vector<1x128xf32>
    %c0_10 = arith.constant 0 : index
    %c0_11 = arith.constant 0 : index
    %9 = vector.load %arg6[%c0_10, %c0_11] : memref<1x128xf32, #tpu.memory_space<vmem>>, vector<1x128xf32>
    tpu.vector_store %arg6[%c0_10, %c0_11], %8 {strides = array<i32>} : memref<1x128xf32, #tpu.memory_space<vmem>>, vector<1x128xf32>,
    return
  }
  func.func @transform_0(%arg0: i32) -> (i32, i32) {
    %c0_i32 = arith.constant 0 : i32
    %c0_i32_0 = arith.constant 0 : i32
    return %arg0, %c0_i32 : i32, i32
  }
  func.func @transform_1(%arg0: i32) -> (i32, i32) {
    %c0_i32 = arith.constant 0 : i32
    %c0_i32_0 = arith.constant 0 : i32
    return %arg0, %c0_i32 : i32, i32
  }
  func.func @transform_2(%arg0: i32) -> (i32, i32) {
    %c0_i32 = arith.constant 0 : i32
    %c0_i32_0 = arith.constant 0 : i32
    %c0_i32_1 = arith.constant 0 : i32
    return %c0_i32, %c0_i32_0 : i32, i32
  }
  func.func @transform_3(%arg0: i32) -> (i32, i32) {
    %c0_i32 = arith.constant 0 : i32
    %c0_i32_0 = arith.constant 0 : i32
    %c0_i32_1 = arith.constant 0 : i32
    return %c0_i32, %c0_i32_0 : i32, i32
  }
  func.func @transform_4(%arg0: i32) -> (i32, i32) {
    %c0_i32 = arith.constant 0 : i32
    %c0_i32_0 = arith.constant 0 : i32
    %c0_i32_1 = arith.constant 0 : i32
    return %c0_i32, %c0_i32_0 : i32, i32
  }
  func.func @transform_5(%arg0: i32) -> (i32, i32) {
    %c0_i32 = arith.constant 0 : i32
    %c0_i32_0 = arith.constant 0 : i32
    return %arg0, %c0_i32 : i32, i32
  }
}

</mosaic_0001>

<bundles_post_ra>
// kernel: fair_decoder_forward.1
= control target key start
LH: loop header
LB: loop body
LE: loop exit
PB: predicated region body
PF: predicated region fallthrough
CT: control target
= control target key end

     0   :  { %10 = vsyncpa [#allocation3], 0  ;;  %s180_s21 = smov [#allocation2]   ;;  %s181_s23 = smov 128   ;;  %s231_s0 = inlined_call_operand.vmem [shape: f32[1,248], index: 0, kind: input, shape index: {}]   ;;  %s232_s1 = inlined_call_operand.vmem [shape: f32[1,8], index: 1, kind: input, shape index: {}]   ;;  %s233_s2 = inlined_call_operand.hbm [shape: f32[248,128], index: 2, kind: input, shape index: {}]   ;;  %s234_s3 = inlined_call_operand.vmem [shape: f32[8,128], index: 3, kind: input, shape index: {}]   ;;  %s235_s4 = inlined_call_operand.vmem [shape: f32[1,128], index: 4, kind: input, shape index: {}]   ;;  %s236_s5 = inlined_call_operand.vmem [shape: f32[1,128], index: 5, kind: output, shape index: {}]  }
   0x1   :  { %s19_s20 = sshll.u32 %s233_s2, 4  ;;  %s21_s22 = sshll.u32 %s180_s21, 4  ;;  %s20_s20 = int_to_ptr.hbm [resolvable:$true] %s19_s20  ;;  %s22_s22 = int_to_ptr.vmem [resolvable:$true] %s21_s22 }
   0x2   :  { %s182_s24 = smov 8  }
   0x3   :  { %27 = dma.hbm_to_vmem [thread:$0]  %s20_s20, 3968, %s22_s22, [#allocation3], %s181_s23, %s181_s23, %s182_s24  }
   0x4   :  { %178 = dma.done.wait [#allocation3], 3968  }
   0x5   :  { %179 = vsyncadd [#allocation3], 4294963328  ;;  %v67_v0 = vld [vmem:[#allocation2 + $0xf0] sm:$0xff]  ;;  %v52_v1 = vld [vmem:[#allocation2 + $0x78] sm:$0xff]  ;;  %vm70_vm0 = vcmask 64512   ;;  %vm98_vm1 = vcmask 982016  }
   0x6   :  { %v66_v2 = vld [vmem:[#allocation2 + $0xe8] sm:$0xff]  ;;  %122 = vmatpush.msra.mxu2 %v67_v0  ;;  %101 = vmatpush.msra.mxu1 %v52_v1  ;;  %v51_v3 = vld [vmem:[#allocation2 + $0x70] sm:$0xff]  ;;  %v65_v4 = vld [vmem:[#allocation2 + $0xe0] sm:$0xff] }
   0x7   :  { %v50_v5 = vld [vmem:[#allocation2 + $0x68] sm:$0xff]  ;;  %v64_v6 = vld [vmem:[#allocation2 + $0xd8] sm:$0xff]  ;;  %v49_v7 = vld [vmem:[#allocation2 + $0x60] sm:$0xff] }
   0x8   :  { %123 = vmatpush.msra.mxu2 %v66_v2  ;;  %102 = vmatpush.msra.mxu1 %v51_v3  ;;  %v63_v8 = vld [vmem:[#allocation2 + $0xd0] sm:$0xff]  ;;  %v48_v9 = vld [vmem:[#allocation2 + $0x58] sm:$0xff]  ;;  %v62_v10 = vld [vmem:[#allocation2 + $0xc8] sm:$0xff] }
   0x9   :  { %v47_v11 = vld [vmem:[#allocation2 + $0x50] sm:$0xff]  ;;  %v61_v12 = vld [vmem:[#allocation2 + $0xc0] sm:$0xff]  ;;  %v46_v13 = vld [vmem:[#allocation2 + $0x48] sm:$0xff] }
   0xa   :  { %124 = vmatpush.msra.mxu2 %v65_v4  ;;  %103 = vmatpush.msra.mxu1 %v50_v5  ;;  %v69_v14 = vld [vmem:[%s234_s3] sm:$0xff]  ;;  %v60_v16 = vld [vmem:[#allocation2 + $0xb8] sm:$0xff]  ;;  %v59_v18 = vld [vmem:[#allocation2 + $0xb0] sm:$0xff] }
   0xb   :  { %v68_v15 = vld [vmem:[%s232_s1] sm:$0x1]  ;;  %89 = vmatpush.msra.mxu0 %v69_v14  ;;  %v44_v19 = vld [vmem:[#allocation2 + $0x38] sm:$0xff]  ;;  %v58_v20 = vld [vmem:[#allocation2 + $0xa8] sm:$0xff] }
   0xc   :  { %125 = vmatpush.msra.mxu2 %v64_v6  ;;  %104 = vmatpush.msra.mxu1 %v49_v7  ;;  %v45_v17 = vld [vmem:[#allocation2 + $0x40] sm:$0xff]  ;;  %v43_v21 = vld [vmem:[#allocation2 + $0x30] sm:$0xff]  ;;  %v42_v23 = vld [vmem:[#allocation2 + $0x28] sm:$0xff] }
   0xd   :  { %149 = vmatmul.msk.f32.vlgmr.msra.gmra.mxu0 %vm70_vm0, %v68_v15  ;;  %v57_v22 = vld [vmem:[#allocation2 + $0xa0] sm:$0xff]  ;;  %v56_v24 = vld [vmem:[#allocation2 + $0x98] sm:$0xff]  ;;  %v55_v26 = vld [vmem:[#allocation2 + $0x90] sm:$0xff] }
   0xe   :  { %126 = vmatpush.msra.mxu2 %v63_v8  ;;  %105 = vmatpush.msra.mxu1 %v48_v9  ;;  %v41_v25 = vld [vmem:[#allocation2 + $0x20] sm:$0xff]  ;;  %v40_v27 = vld [vmem:[#allocation2 + $0x18] sm:$0xff]  ;;  %v54_v29 = vld [vmem:[#allocation2 + $0x88] sm:$0xff] }
   0xf   :  { %v36_v28 = vld [vmem:[%s231_s0] sm:$0x3]  ;;  %v39_v30 = vld [vmem:[#allocation2 + $0x10] sm:$0xff]  ;;  %v38_v33 = vld [vmem:[#allocation2 + $0x8] sm:$0xff] }
  0x10   :  { %127 = vmatpush.msra.mxu2 %v62_v10  ;;  %106 = vmatpush.msra.mxu1 %v47_v11  ;;  %v53_v31 = vld [vmem:[#allocation2 + $0x80] sm:$0xff]  ;;  %v96_v32 = vperm.slane %v36_v28, 1  ;;  %v95_v35 = vperm.slane %v36_v28, 0 }
  0x11   :  { %v37_v34 = vld [vmem:[#allocation2] sm:$0xff] }
  0x12   :  { %128 = vmatpush.msra.mxu2 %v61_v12  ;;  %107 = vmatpush.msra.mxu1 %v46_v13  ;;  %v141_v40 = vld [vmem:[%s235_s4] sm:$0x1] }
  0x14   :  { %129 = vmatpush.msra.mxu2 %v60_v16  ;;  %108 = vmatpush.msra.mxu1 %v45_v17 }
  0x16   :  { %130 = vmatpush.msra.mxu2 %v59_v18  ;;  %109 = vmatpush.msra.mxu1 %v44_v19 }
  0x18   :  { %131 = vmatpush.msra.mxu2 %v58_v20  ;;  %110 = vmatpush.msra.mxu1 %v43_v21 }
  0x1a   :  { %132 = vmatpush.msra.mxu2 %v57_v22  ;;  %111 = vmatpush.msra.mxu1 %v42_v23 }
  0x1c   :  { %133 = vmatpush.msra.mxu2 %v56_v24  ;;  %112 = vmatpush.msra.mxu1 %v41_v25 }
  0x1e   :  { %134 = vmatpush.msra.mxu2 %v55_v26  ;;  %113 = vmatpush.msra.mxu1 %v40_v27 }
  0x20   :  { %135 = vmatpush.msra.mxu2 %v54_v29  ;;  %114 = vmatpush.msra.mxu1 %v39_v30 }
  0x22   :  { %136 = vmatpush.msra.mxu2 %v53_v31  ;;  %115 = vmatpush.msra.mxu1 %v38_v33 }
  0x23   :  { %150 = vmatmul.msk.f32.vlgmr.msra.gmra.mxu2 %vm98_vm1, %v96_v32 }
  0x24   :  { %116 = vmatpush.msra.mxu1 %v37_v34 }
  0x25   :  { %117 = vmatmul.f32.vlgmr.msra.gmra.mxu1 %v95_v35 }
  0x8a   :  { %v91_v36 = vpop.f32.mrf.mxu0 }
  0xa2   :  { %v118_v37 = vpop.f32.mrf.mxu1 }
  0xa3   :  { %v119_v38 = vadd.f32 %v118_v37, %v91_v36 }
  0xa6   :  { %v138_v39 = vpop.f32.mrf.mxu2 }
  0xa7   :  { %v139_v41 = vadd.f32 %v138_v39, %v119_v38 }
  0xa9   :  { %v142_v42 = vadd.f32 %v141_v40, %v139_v41 }
  0xab   :  { %143 = vst [vmem:[%s236_s5] sm:$0x1] %v142_v42 }
  0xac   :  { %148 = vsyncpa [#allocation3], 1 }

</bundles_post_ra>
